<compile_context>
chip_gen: v6e
topology: v6e:2x2x1
jax: 0.10.0
libtpu: 0.0.40
codegen_flags: <defaults>
</compile_context>

<pallas_src>
import math

import jax
import jax.numpy as jnp
from jax import lax
from jax.experimental import pallas as pl
from jax.experimental.pallas import tpu as pltpu

EPS = 1e-5
NEG_SLOPE = 0.2


def _block_kernel(p_ref, w_ref, o_ref):
    # p_ref: (B_TILE, K_pad, P)   bf16 im2col patches (lane dim = P)
    # w_ref: (C_TILE, K_pad)      bf16 conv weights
    # o_ref: (B_TILE, C_TILE, P)  f32 output (lane dim = P -> lane-dense stores)
    b_tile = p_ref.shape[0]
    p_dim = p_ref.shape[2]
    inv_p = 1.0 / float(p_dim)

    w = w_ref[...]                                  # hoisted, shared across b

    for b in range(b_tile):                         # small static unroll
        # Convolution as a matmul on the MXU, f32 accumulation.
        y = jnp.dot(w, p_ref[b], preferred_element_type=jnp.float32)  # (C_TILE, P)

        # InstanceNorm2d(affine=False, eps=1e-5): per-channel stats over spatial P,
        # fused single pass (sum and sum-of-squares), all math in f32.
        s = jnp.sum(y, axis=-1, keepdims=True)                         # (C_TILE, 1)
        ss = jnp.sum(y * y, axis=-1, keepdims=True)                    # (C_TILE, 1)
        mean = s * inv_p
        var = jnp.maximum(ss * inv_p - mean * mean, 0.0)
        y_norm = (y - mean) * lax.rsqrt(var + EPS)

        # LeakyReLU(0.2)
        out = jnp.where(y_norm > 0, y_norm, NEG_SLOPE * y_norm)
        o_ref[b] = out.astype(o_ref.dtype)


def _largest_divisor_at_most(n, cap):
    for d in range(min(n, cap), 0, -1):
        if n % d == 0:
            return d
    return 1


def block_forward(x, weight, *, compute_dtype=jnp.bfloat16, b_tile=None, c_tile=None):
    """x: (N, C_in, H, W) f32; weight: (C_out, C_in, 4, 4) f32 -> (N, C_out, H/2, W/2)."""
    N, C_in, H, W = x.shape
    C_out = weight.shape[0]
    KH = KW = 4
    stride = 2
    H_out = (H + 2 - KH) // stride + 1
    W_out = (W + 2 - KW) // stride + 1
    P = H_out * W_out
    K = C_in * KH * KW
    K_pad = ((K + 127) // 128) * 128          # full-lane loads / full MXU contraction

    if b_tile is None:
        b_tile = _largest_divisor_at_most(N, 4)
    if c_tile is None:
        c_tile = _largest_divisor_at_most(C_out, 256)

    # Keep the (double-buffered) per-step working set inside a conservative VMEM
    # budget so the same code is safe on v7x (64 MiB physical VMEM).
    def _footprint(bt, ct):
        return 2 * (bt * K_pad * P * 2 + ct * K_pad * 2 + bt * ct * P * 4)

    while b_tile > 1 and _footprint(b_tile, c_tile) > 24 * 1024 * 1024:
        b_tile = _largest_divisor_at_most(N, b_tile - 1)
    while c_tile > 8 and c_tile % 2 == 0 and _footprint(b_tile, c_tile) > 24 * 1024 * 1024:
        c_tile //= 2

    n_b = N // b_tile
    n_c = C_out // c_tile

    # ---- glue (pure JAX): reflect pad + im2col straight into (N, K_pad, P) bf16 ----
    xp = jnp.pad(x, ((0, 0), (0, 0), (1, 1), (1, 1)), mode="reflect")
    cols = [
        xp[:, :, kh:kh + stride * H_out:stride, kw:kw + stride * W_out:stride]
        .reshape(N, C_in, P)
        for kh in range(KH) for kw in range(KW)
    ]
    patches = jnp.stack(cols, axis=2).reshape(N, K, P)        # (N, C_in*16, P)
    if K_pad != K:
        patches = jnp.pad(patches, ((0, 0), (0, K_pad - K), (0, 0)))
    patches = patches.astype(compute_dtype)

    w_mat = weight.reshape(C_out, K)                          # index c*16 + kh*4 + kw
    if K_pad != K:
        w_mat = jnp.pad(w_mat, ((0, 0), (0, K_pad - K)))
    w_mat = w_mat.astype(compute_dtype)

    cost = pl.CostEstimate(
        flops=2 * N * C_out * K_pad * P + 8 * N * C_out * P,
        transcendentals=N * C_out,
        bytes_accessed=(patches.size * patches.dtype.itemsize
                        + w_mat.size * w_mat.dtype.itemsize * n_b
                        + N * C_out * P * 4),
    )

    out_flat = pl.pallas_call(
        _block_kernel,
        out_shape=jax.ShapeDtypeStruct((N, C_out, P), x.dtype),
        grid_spec=pltpu.PrefetchScalarGridSpec(
            num_scalar_prefetch=0,
            grid=(n_b, n_c),
            in_specs=[
                pl.BlockSpec((b_tile, K_pad, P), lambda nb, cb: (nb, 0, 0)),
                pl.BlockSpec((c_tile, K_pad), lambda nb, cb: (cb, 0)),
            ],
            out_specs=pl.BlockSpec((b_tile, c_tile, P), lambda nb, cb: (nb, cb, 0)),
        ),
        compiler_params=pltpu.CompilerParams(
            dimension_semantics=("parallel", "parallel"),
            vmem_limit_bytes=64 * 1024 * 1024,
        ),
        cost_estimate=cost,
    )(patches, w_mat)

    # (N, C_out, P) -> NCHW is a pure reshape: no post-kernel transpose traffic.
    return out_flat.reshape(N, C_out, H_out, W_out)


def _reference_f32(x, weight):
    """Pure-JAX f32 reference (reflect-pad conv -> instance norm -> leaky relu)."""
    xp = jnp.pad(x, ((0, 0), (0, 0), (1, 1), (1, 1)), mode="reflect")
    y = lax.conv_general_dilated(
        xp, weight, window_strides=(2, 2), padding="VALID",
        dimension_numbers=("NCHW", "OIHW", "NCHW"))
    mean = jnp.mean(y, axis=(2, 3), keepdims=True)
    var = jnp.mean((y - mean) ** 2, axis=(2, 3), keepdims=True)
    yn = (y - mean) * lax.rsqrt(var + EPS)
    return jnp.where(yn > 0, yn, NEG_SLOPE * yn)


def _reference_matched(x, weight, compute_dtype=jnp.bfloat16):
    """Same math with conv operands in the kernel's compute dtype (f32 accumulation)."""
    xp = jnp.pad(x, ((0, 0), (0, 0), (1, 1), (1, 1)), mode="reflect")
    y = lax.conv_general_dilated(
        xp.astype(compute_dtype), weight.astype(compute_dtype),
        window_strides=(2, 2), padding="VALID",
        dimension_numbers=("NCHW", "OIHW", "NCHW"),
        preferred_element_type=jnp.float32)
    mean = jnp.mean(y, axis=(2, 3), keepdims=True)
    var = jnp.mean((y - mean) ** 2, axis=(2, 3), keepdims=True)
    yn = (y - mean) * lax.rsqrt(var + EPS)
    return jnp.where(yn > 0, yn, NEG_SLOPE * yn).astype(x.dtype)


if __name__ == "__main__":
    key = jax.random.PRNGKey(0)
    kx, kw = jax.random.split(key)

    N, C_in, H, W = 2, 4, 16, 16
    C_out = 8

    x = jax.random.normal(kx, (N, C_in, H, W), dtype=jnp.float32)
    # deterministic synthetic weights (Conv2d(C_in, C_out, 4, 4), bias=False)
    weight = jax.random.normal(kw, (C_out, C_in, 4, 4), dtype=jnp.float32) * 0.1

    out = jax.jit(block_forward)(x, weight)
    jax.block_until_ready(out)
    assert out.shape == (N, C_out, H // 2, W // 2), out.shape

    # Tight check against a reference using the same (bf16-in, f32-acc) precision.
    ref_m = _reference_matched(x, weight)
    assert jnp.allclose(out, ref_m, rtol=2e-3, atol=2e-3), float(
        jnp.max(jnp.abs(out - ref_m)))

    # Sanity check against the full-f32 reference (bf16 input rounding only).
    ref32 = _reference_f32(x, weight)
    assert jnp.allclose(out, ref32, rtol=5e-2, atol=5e-2), float(
        jnp.max(jnp.abs(out - ref32)))

    print("KERNEL_OK")
</pallas_src>

<mosaic_0001>
module attributes {stable_mosaic.version = 11 : i64} {
  func.func @_block_kernel(%arg0: i32, %arg1: i32, %arg2: memref<2x128x64xbf16, #tpu.memory_space<vmem>>, %arg3: memref<8x128xbf16, #tpu.memory_space<vmem>>, %arg4: memref<2x8x64xf32, #tpu.memory_space<vmem>>) attributes {dimension_semantics = [#tpu.dimension_semantics<parallel>, #tpu.dimension_semantics<parallel>], iteration_bounds = array<i64: 1, 1>, scalar_prefetch = 0 : i64, scratch_operands = 0 : i64, tpu.core_type = #tpu.core_type<tc>, window_params = [{transform_indices = @transform_0, window_bounds = array<i64: 2, 128, 64>}, {transform_indices = @transform_1, window_bounds = array<i64: 8, 128>}, {transform_indices = @transform_2, window_bounds = array<i64: 2, 8, 64>}]} {
    %c0 = arith.constant 0 : index
    %c0_0 = arith.constant 0 : index
    %0 = vector.load %arg3[%c0, %c0_0] : memref<8x128xbf16, #tpu.memory_space<vmem>>, vector<8x128xbf16>
    %c0_1 = arith.constant 0 : index
    %c0_2 = arith.constant 0 : index
    %c0_3 = arith.constant 0 : index
    %1 = vector.load %arg2[%c0_1, %c0_2, %c0_3] : memref<2x128x64xbf16, #tpu.memory_space<vmem>>, vector<1x128x64xbf16>
    %2 = vector.shape_cast %1 : vector<1x128x64xbf16> to vector<128x64xbf16>
    %cst = arith.constant dense<0.000000e+00> : vector<8x64xf32>
    %3 = tpu.matmul %0, %2, %cst {dimension_numbers = #tpu.dot_dimension_numbers<[1], [0], [0], [1], [0, 0, 1, 1], [], []>} : vector<8x128xbf16>, vector<128x64xbf16>, vector<8x64xf32> -> vector<8x64xf32>
    %cst_4 = arith.constant dense<0.000000e+00> : vector<8xf32>
    %4 = vector.multi_reduction <add>, %3, %cst_4 [1] : vector<8x64xf32> to vector<8xf32>
    %5 = vector.shape_cast %4 : vector<8xf32> to vector<8x1xf32>
    %6 = arith.mulf %3, %3 : vector<8x64xf32>
    %cst_5 = arith.constant dense<0.000000e+00> : vector<8xf32>
    %7 = vector.multi_reduction <add>, %6, %cst_5 [1] : vector<8x64xf32> to vector<8xf32>
    %8 = vector.shape_cast %7 : vector<8xf32> to vector<8x1xf32>
    %cst_6 = arith.constant 1.562500e-02 : f32
    %9 = vector.broadcast %cst_6 : f32 to vector<8x1xf32>
    %10 = arith.mulf %5, %9 : vector<8x1xf32>
    %cst_7 = arith.constant 1.562500e-02 : f32
    %11 = vector.broadcast %cst_7 : f32 to vector<8x1xf32>
    %12 = arith.mulf %8, %11 : vector<8x1xf32>
    %13 = arith.mulf %10, %10 : vector<8x1xf32>
    %14 = arith.subf %12, %13 : vector<8x1xf32>
    %cst_8 = arith.constant 0.000000e+00 : f32
    %15 = vector.broadcast %cst_8 : f32 to vector<8x1xf32>
    %16 = arith.maximumf %14, %15 : vector<8x1xf32>
    %17 = vector.broadcast %10 : vector<8x1xf32> to vector<8x64xf32>
    %18 = arith.subf %3, %17 : vector<8x64xf32>
    %cst_9 = arith.constant 9.99999974E-6 : f32
    %19 = vector.broadcast %cst_9 : f32 to vector<8x1xf32>
    %20 = arith.addf %16, %19 : vector<8x1xf32>
    %21 = math.rsqrt %20 : vector<8x1xf32>
    %22 = vector.broadcast %21 : vector<8x1xf32> to vector<8x64xf32>
    %23 = arith.mulf %18, %22 : vector<8x64xf32>
    %cst_10 = arith.constant 0.000000e+00 : f32
    %24 = vector.broadcast %cst_10 : f32 to vector<8x64xf32>
    %25 = arith.cmpf ogt, %23, %24 : vector<8x64xf32>
    %cst_11 = arith.constant 2.000000e-01 : f32
    %26 = vector.broadcast %cst_11 : f32 to vector<8x64xf32>
    %27 = arith.mulf %26, %23 : vector<8x64xf32>
    %28 = arith.select %25, %23, %27 : vector<8x64xi1>, vector<8x64xf32>
    %c0_12 = arith.constant 0 : index
    %c0_13 = arith.constant 0 : index
    %c0_14 = arith.constant 0 : index
    %29 = vector.load %arg4[%c0_12, %c0_13, %c0_14] : memref<2x8x64xf32, #tpu.memory_space<vmem>>, vector<1x8x64xf32>
    %30 = vector.shape_cast %29 : vector<1x8x64xf32> to vector<8x64xf32>
    %31 = vector.shape_cast %28 : vector<8x64xf32> to vector<1x8x64xf32>
    tpu.vector_store %arg4[%c0_12, %c0_13, %c0_14], %31 {strides = array<i32>} : memref<2x8x64xf32, #tpu.memory_space<vmem>>, vector<1x8x64xf32>,
    %c1 = arith.constant 1 : index
    %c0_15 = arith.constant 0 : index
    %c0_16 = arith.constant 0 : index
    %32 = vector.load %arg2[%c1, %c0_15, %c0_16] : memref<2x128x64xbf16, #tpu.memory_space<vmem>>, vector<1x128x64xbf16>
    %33 = vector.shape_cast %32 : vector<1x128x64xbf16> to vector<128x64xbf16>
    %cst_17 = arith.constant dense<0.000000e+00> : vector<8x64xf32>
    %34 = tpu.matmul %0, %33, %cst_17 {dimension_numbers = #tpu.dot_dimension_numbers<[1], [0], [0], [1], [0, 0, 1, 1], [], []>} : vector<8x128xbf16>, vector<128x64xbf16>, vector<8x64xf32> -> vector<8x64xf32>
    %cst_18 = arith.constant dense<0.000000e+00> : vector<8xf32>
    %35 = vector.multi_reduction <add>, %34, %cst_18 [1] : vector<8x64xf32> to vector<8xf32>
    %36 = vector.shape_cast %35 : vector<8xf32> to vector<8x1xf32>
    %37 = arith.mulf %34, %34 : vector<8x64xf32>
    %cst_19 = arith.constant dense<0.000000e+00> : vector<8xf32>
    %38 = vector.multi_reduction <add>, %37, %cst_19 [1] : vector<8x64xf32> to vector<8xf32>
    %39 = vector.shape_cast %38 : vector<8xf32> to vector<8x1xf32>
    %cst_20 = arith.constant 1.562500e-02 : f32
    %40 = vector.broadcast %cst_20 : f32 to vector<8x1xf32>
    %41 = arith.mulf %36, %40 : vector<8x1xf32>
    %cst_21 = arith.constant 1.562500e-02 : f32
    %42 = vector.broadcast %cst_21 : f32 to vector<8x1xf32>
    %43 = arith.mulf %39, %42 : vector<8x1xf32>
    %44 = arith.mulf %41, %41 : vector<8x1xf32>
    %45 = arith.subf %43, %44 : vector<8x1xf32>
    %cst_22 = arith.constant 0.000000e+00 : f32
    %46 = vector.broadcast %cst_22 : f32 to vector<8x1xf32>
    %47 = arith.maximumf %45, %46 : vector<8x1xf32>
    %48 = vector.broadcast %41 : vector<8x1xf32> to vector<8x64xf32>
    %49 = arith.subf %34, %48 : vector<8x64xf32>
    %cst_23 = arith.constant 9.99999974E-6 : f32
    %50 = vector.broadcast %cst_23 : f32 to vector<8x1xf32>
    %51 = arith.addf %47, %50 : vector<8x1xf32>
    %52 = math.rsqrt %51 : vector<8x1xf32>
    %53 = vector.broadcast %52 : vector<8x1xf32> to vector<8x64xf32>
    %54 = arith.mulf %49, %53 : vector<8x64xf32>
    %cst_24 = arith.constant 0.000000e+00 : f32
    %55 = vector.broadcast %cst_24 : f32 to vector<8x64xf32>
    %56 = arith.cmpf ogt, %54, %55 : vector<8x64xf32>
    %cst_25 = arith.constant 2.000000e-01 : f32
    %57 = vector.broadcast %cst_25 : f32 to vector<8x64xf32>
    %58 = arith.mulf %57, %54 : vector<8x64xf32>
    %59 = arith.select %56, %54, %58 : vector<8x64xi1>, vector<8x64xf32>
    %c1_26 = arith.constant 1 : index
    %c0_27 = arith.constant 0 : index
    %c0_28 = arith.constant 0 : index
    %60 = vector.load %arg4[%c1_26, %c0_27, %c0_28] : memref<2x8x64xf32, #tpu.memory_space<vmem>>, vector<1x8x64xf32>
    %61 = vector.shape_cast %60 : vector<1x8x64xf32> to vector<8x64xf32>
    %62 = vector.shape_cast %59 : vector<8x64xf32> to vector<1x8x64xf32>
    tpu.vector_store %arg4[%c1_26, %c0_27, %c0_28], %62 {strides = array<i32>} : memref<2x8x64xf32, #tpu.memory_space<vmem>>, vector<1x8x64xf32>,
    return
  }
  func.func @transform_0(%arg0: i32, %arg1: i32) -> (i32, i32, i32) {
    %c0_i32 = arith.constant 0 : i32
    %c0_i32_0 = arith.constant 0 : i32
    %c0_i32_1 = arith.constant 0 : i32
    return %arg0, %c0_i32, %c0_i32_0 : i32, i32, i32
  }
  func.func @transform_1(%arg0: i32, %arg1: i32) -> (i32, i32) {
    %c0_i32 = arith.constant 0 : i32
    %c0_i32_0 = arith.constant 0 : i32
    return %arg1, %c0_i32 : i32, i32
  }
  func.func @transform_2(%arg0: i32, %arg1: i32) -> (i32, i32, i32) {
    %c0_i32 = arith.constant 0 : i32
    %c0_i32_0 = arith.constant 0 : i32
    return %arg0, %arg1, %c0_i32 : i32, i32, i32
  }
}

</mosaic_0001>

<bundles_post_ra>
// kernel: block_forward.1
= control target key start
LH: loop header
LB: loop body
LE: loop exit
PB: predicated region body
PF: predicated region fallthrough
CT: control target
= control target key end

     0   :  { %v381_v0 = vmov 0.0   ;;  %vm382_vm0 = vmmov 0   ;;  %vm117_vm1 = vcmask 523264   ;;  %s461_s0 = inlined_call_operand.vmem [shape: bf16[2,128,64], index: 0, kind: input, shape index: {}]   ;;  %s462_s1 = inlined_call_operand.vmem [shape: bf16[8,128], index: 1, kind: input, shape index: {}]   ;;  %s463_s2 = inlined_call_operand.vmem [shape: f32[2,8,64], index: 2, kind: output, shape index: {}]  }
   0x1   :  { %319 = vmatprep.subr.bf16.mxu0 %v381_v0  ;;  %339 = vmatprep.subr.bf16.mxu1 %v381_v0  ;;  %v361_v1 = vld [vmem:[%s461_s0 + $0x38] sm:$0xff]   ;;  %v363_v3 = vld [vmem:[%s461_s0 + $0x30] sm:$0xff]   ;;  %v365_v5 = vld [vmem:[%s461_s0 + $0x28] sm:$0xff]  }
   0x2   :  { %v362_v2 = vld [vmem:[%s461_s0 + $0x78] sm:$0xff]   ;;  %335 = vmatprep.mubr.msk.bf16.mxu0 %vm382_vm0, %v381_v0  ;;  %355 = vmatprep.mubr.msk.bf16.mxu1 %vm382_vm0, %v381_v0  ;;  %v364_v4 = vld [vmem:[%s461_s0 + $0x70] sm:$0xff]   ;;  %v366_v6 = vld [vmem:[%s461_s0 + $0x68] sm:$0xff]  }
   0x3   :  { %320 = vmatpush3.bf16.msra.mxu0 %v361_v1  ;;  %340 = vmatpush3.bf16.msra.mxu1 %v362_v2  ;;  %v367_v7 = vld [vmem:[%s461_s0 + $0x20] sm:$0xff]   ;;  %v369_v9 = vld [vmem:[%s461_s0 + $0x18] sm:$0xff]   ;;  %v371_v11 = vld [vmem:[%s461_s0 + $0x10] sm:$0xff]  }
   0x4   :  { %321 = vmatprep.subr.bf16.mxu0 %v381_v0  ;;  %341 = vmatprep.subr.bf16.mxu1 %v381_v0  ;;  %v368_v8 = vld [vmem:[%s461_s0 + $0x60] sm:$0xff]   ;;  %v370_v10 = vld [vmem:[%s461_s0 + $0x58] sm:$0xff]   ;;  %v372_v12 = vld [vmem:[%s461_s0 + $0x50] sm:$0xff]  }
   0x5   :  { %v373_v13 = vld [vmem:[%s461_s0 + $0x8] sm:$0xff]   ;;  %v375_v15 = vld [vmem:[%s461_s0] sm:$0xff]  }
   0x6   :  { %v374_v14 = vld [vmem:[%s461_s0 + $0x48] sm:$0xff]   ;;  %v376_v16 = vld [vmem:[%s461_s0 + $0x40] sm:$0xff]  }
   0x7   :  { %322 = vmatpush3.bf16.msra.mxu0 %v363_v3  ;;  %342 = vmatpush3.bf16.msra.mxu1 %v364_v4  ;;  %v12_v17 = vld [vmem:[%s462_s1] sm:$0xf] }
   0x8   :  { %323 = vmatprep.subr.bf16.mxu0 %v381_v0  ;;  %343 = vmatprep.subr.bf16.mxu1 %v381_v0 }
   0xb   :  { %324 = vmatpush3.bf16.msra.mxu0 %v365_v5  ;;  %344 = vmatpush3.bf16.msra.mxu1 %v366_v6 }
   0xc   :  { %325 = vmatprep.subr.bf16.mxu0 %v381_v0  ;;  %345 = vmatprep.subr.bf16.mxu1 %v381_v0 }
   0xf   :  { %326 = vmatpush3.bf16.msra.mxu0 %v367_v7  ;;  %346 = vmatpush3.bf16.msra.mxu1 %v368_v8 }
  0x10   :  { %327 = vmatprep.subr.bf16.mxu0 %v381_v0  ;;  %347 = vmatprep.subr.bf16.mxu1 %v381_v0 }
  0x13   :  { %328 = vmatpush3.bf16.msra.mxu0 %v369_v9  ;;  %348 = vmatpush3.bf16.msra.mxu1 %v370_v10 }
  0x14   :  { %329 = vmatprep.subr.bf16.mxu0 %v381_v0  ;;  %349 = vmatprep.subr.bf16.mxu1 %v381_v0 }
  0x17   :  { %330 = vmatpush3.bf16.msra.mxu0 %v371_v11  ;;  %350 = vmatpush3.bf16.msra.mxu1 %v372_v12 }
  0x18   :  { %331 = vmatprep.subr.bf16.mxu0 %v381_v0  ;;  %351 = vmatprep.subr.bf16.mxu1 %v381_v0 }
  0x1b   :  { %332 = vmatpush3.bf16.msra.mxu0 %v373_v13  ;;  %352 = vmatpush3.bf16.msra.mxu1 %v374_v14 }
  0x1c   :  { %333 = vmatprep.subr.bf16.mxu0 %v381_v0  ;;  %353 = vmatprep.subr.bf16.mxu1 %v381_v0 }
  0x1f   :  { %334 = vmatpush3.bf16.msra.mxu0 %v375_v15  ;;  %354 = vmatpush3.bf16.msra.mxu1 %v376_v16 }
  0x22   :  { %336 = vmatmul.mubr.bf16.vlgmr.msra.gmra.mxu0 %v12_v17  ;;  %356 = vmatmul.mubr.bf16.vlgmr.msra.gmra.mxu1 %v12_v17 }
  0xe2   :  { %v111_v18 = vpop.f32.mrf.mxu0  ;;  %v237_v19 = vpop.f32.mrf.mxu1 }
  0xe3   :  { %v118_v20 = vsel %vm117_vm1, %v111_v18, 0.0  ;;  %v121_v21 = vmul.f32 %v111_v18, %v111_v18  ;;  %v246_v23 = vmul.f32 %v237_v19, %v237_v19  ;;  %v243_v26 = vsel %vm117_vm1, %v237_v19, 0.0 }
  0xe4   :  { %119 = vadd.xlane.f32.xlu0 %v118_v20  ;;  %v337_v22 = vpop.f32.mrf.mxu0  ;;  %v357_v24 = vpop.f32.mrf.mxu1 }
  0xe5   :  { %v122_v25 = vsel %vm117_vm1, %v121_v21, 0.0  ;;  %v247_v29 = vsel %vm117_vm1, %v246_v23, 0.0 }
  0xe6   :  { %123 = vadd.xlane.f32.xlu1 %v122_v25  ;;  %v114_v27 = vpop.f32.mrf.mxu0  ;;  %v240_v28 = vpop.f32.mrf.mxu1 }
  0xe8   :  { %244 = vadd.xlane.f32.xlu0 %v243_v26  ;;  %v338_v30 = vpop.f32.mrf.mxu0  ;;  %v358_v31 = vpop.f32.mrf.mxu1 }
  0xea   :  { %248 = vadd.xlane.f32.xlu1 %v247_v29 }
 0x16d   :  { %v120_v32 = vpop.xlane.xlu0 %119 }
 0x16e   :  { %v125_v33 = vmul.f32 0.015625, %v120_v32 }
 0x16f   :  { %v124_v34 = vpop.xlane.xlu1 %123 }
 0x170   :  { %v127_v35 = vmul.f32 %v125_v33, %v125_v33  ;;  %v126_v36 = vmul.f32 0.015625, %v124_v34  ;;  %v130_v48 = vsub.f32 %v111_v18, %v125_v33 }
 0x171   :  { %v245_v37 = vpop.xlane.xlu0 %244 }
 0x172   :  { %v128_v38 = vsub.f32 %v126_v36, %v127_v35  ;;  %v250_v39 = vmul.f32 0.015625, %v245_v37 }
 0x173   :  { %v249_v40 = vpop.xlane.xlu1 %248 }
 0x174   :  { %v129_v41 = vmax.f32 %v128_v38, 0.0  ;;  %v252_v42 = vmul.f32 %v250_v39, %v250_v39  ;;  %v251_v43 = vmul.f32 0.015625, %v249_v40  ;;  %v255_v52 = vsub.f32 %v237_v19, %v250_v39 }
 0x176   :  { %v131_v44 = vadd.f32 1e-05, %v129_v41  ;;  %v253_v45 = vsub.f32 %v251_v43, %v252_v42 }
 0x178   :  { %377 = vrsqrt.f32 %v131_v44  ;;  %v254_v46 = vmax.f32 %v253_v45, 0.0 }
 0x17a   :  { %v256_v47 = vadd.f32 1e-05, %v254_v46 }
 0x17c   :  { %379 = vrsqrt.f32 %v256_v47 }
 0x185   :  { %v378_v49 = vpop.eup %377 }
 0x186   :  { %v133_v50 = vmul.f32 %v378_v49, %v130_v48 }
 0x188   :  { %vm134_vm2 = vcmp.gt.f32.partialorder %v133_v50, 0.0  ;;  %v135_v51 = vmul.f32 0.2, %v133_v50 }
 0x189   :  { %v380_v53 = vpop.eup %379 }
 0x18a   :  { %v136_v54 = vsel %vm134_vm2, %v133_v50, %v135_v51  ;;  %v258_v55 = vmul.f32 %v380_v53, %v255_v52 }
 0x18b   :  { %137 = vst.msk [vmem:[%s463_s2] sm:$0xff] %vm117_vm1, %v136_v54 }
 0x18c   :  { %vm259_vm3 = vcmp.gt.f32.partialorder %v258_v55, 0.0  ;;  %v260_v56 = vmul.f32 0.2, %v258_v55 }
 0x18e   :  { %v261_v57 = vsel %vm259_vm3, %v258_v55, %v260_v56 }
 0x18f   :  { %300 = vst.msk [vmem:[%s463_s2 + $0x8] sm:$0xff] %vm117_vm1, %v261_v57 }

</bundles_post_ra>
